<compile_context>
chip_gen: v7x
topology: tpu7x:2x2x1
jax: 0.10.0
libtpu: 0.0.40
codegen_flags: <defaults>
</compile_context>

<pallas_src>
import functools

import numpy as np
import jax
import jax.numpy as jnp
from jax.experimental import pallas as pl
from jax.experimental.pallas import tpu as pltpu


def _bilinear_matrix(out_size: int, in_size: int) -> np.ndarray:
    """Interpolation matrix M (out_size, in_size) reproducing
    F.interpolate(mode='bilinear', align_corners=False) along one axis."""
    o = np.arange(out_size, dtype=np.float64)
    src = (o + 0.5) * (in_size / out_size) - 0.5
    src = np.maximum(src, 0.0)                      # PyTorch clamps negative src to 0
    i0 = np.minimum(np.floor(src).astype(np.int64), in_size - 1)
    i1 = np.minimum(i0 + 1, in_size - 1)
    w1 = src - i0
    w0 = 1.0 - w1
    M = np.zeros((out_size, in_size), dtype=np.float64)
    M[np.arange(out_size), i0] += w0
    M[np.arange(out_size), i1] += w1
    return M.astype(np.float32)


def _depth_loss_kernel(mwt_ref, mh_ref, pred_ref, tgt_ref, out_ref,
                       *, alpha, beta, inv_l1, inv_gx, inv_gy, mxu_dtype):
    # pred_ref: (TB, Hp, Wp) source dtype        tgt_ref: (TB, Ht, Wt) source dtype
    # mwt_ref : (TB, Wp, Wt) mxu_dtype (mw^T, broadcast over the block's batch dim)
    # mh_ref  : (TB, Ht, Hp) mxu_dtype (mh,  broadcast over the block's batch dim)
    p = pred_ref[...].astype(mxu_dtype)          # bf16 inputs feed the MXU directly
    t = tgt_ref[...].astype(jnp.float32)

    # Separable bilinear resize as two batched per-image matmuls
    # (no block-diagonal zero-work, no in-kernel transposes or reshapes).
    r = jnp.einsum('bhw,bwo->bho', p, mwt_ref[...],
                   preferred_element_type=jnp.float32).astype(mxu_dtype)   # (TB, Hp, Wt)
    r = jnp.einsum('boh,bhw->bow', mh_ref[...], r,
                   preferred_element_type=jnp.float32)                     # (TB, Ht, Wt)

    # Single diff feeds the L1 and both gradient terms.
    d = r - t
    s_l1 = jnp.sum(jnp.abs(d))
    s_gx = jnp.sum(jnp.abs(d[:, :, 1:] - d[:, :, :-1]))
    # grad-y stays inside each image (per-batch rows), so no boundary mask is needed.
    s_gy = jnp.sum(jnp.abs(d[:, 1:, :] - d[:, :-1, :]))

    val = alpha * (s_l1 * inv_l1) + beta * (s_gx * inv_gx + s_gy * inv_gy)
    # Lane-dense, (8,128)-aligned store of the per-block partial loss.
    out_ref[...] = jnp.full((1, 8, 128), val, dtype=jnp.float32)


def _vmem_estimate(tb, Hp, Wp, Ht, Wt, in_bytes, mat_bytes):
    """Conservative per-step VMEM footprint (bytes) for a block of `tb` images."""
    io = 2 * tb * (Hp * Wp + Ht * Wt) * in_bytes          # double-buffered pred+target blocks
    consts = 2 * tb * (Wp * Wt + Ht * Hp) * mat_bytes     # resident matrices (default 2x-buffered)
    temps = tb * (Hp * Wp + Hp * Wt + 5 * Ht * Wt) * 4    # f32 casts, r_col, r/d and grad temporaries
    out = 2 * 8 * 128 * 4
    return io + consts + temps + out


def _choose_block(N, Hp, Wp, Ht, Wt, in_bytes, mat_bytes, budget):
    """Images per grid step: largest exact divisor of N that fits the VMEM budget,
    capped so NB >= 2 (engages both v7x TensorCores via the parallel grid axis).
    Exact divisors also avoid any wrapper-side zero-pad HBM copy / ragged masking."""
    if N <= 1:
        return 1
    best = 1
    for tb in range(1, min(N // 2, 4096) + 1):
        if N % tb:
            continue
        if _vmem_estimate(tb, Hp, Wp, Ht, Wt, in_bytes, mat_bytes) <= budget:
            best = tb
    return best


def depth_loss(pred, target, alpha=0.5, beta=0.5):
    """pred: (B, C, Hp, Wp), target: (B, C, Ht, Wt)  ->  scalar loss (float32)."""
    B, C, Hp, Wp = pred.shape
    Bt, Ct, Ht, Wt = target.shape
    assert (B, C) == (Bt, Ct)
    N = B * C

    # bf16 stays bf16 for the MXU (bf16-native on v6e/v7x); everything else is f32.
    mxu_dtype = jnp.bfloat16 if pred.dtype == jnp.bfloat16 else jnp.float32
    in_bytes = pred.dtype.itemsize
    mat_bytes = 2 if mxu_dtype == jnp.bfloat16 else 4

    # Generation-aware VMEM budget (v5e/v6e: 128 MiB physical, v7x: 64 MiB per TC).
    try:
        vmem_cap = int(pltpu.get_tpu_info().vmem_capacity_bytes)
    except Exception:
        vmem_cap = 64 << 20
    budget = min(vmem_cap // 2, 32 << 20)

    TB = _choose_block(N, Hp, Wp, Ht, Wt, in_bytes, mat_bytes, budget)
    NB = N // TB
    est = _vmem_estimate(TB, Hp, Wp, Ht, Wt, in_bytes, mat_bytes)
    vmem_limit = int(min(vmem_cap * 9 // 10, max(est + (8 << 20), 32 << 20)))

    # Host-side interpolation matrices, broadcast per image of the block; they have
    # constant index_maps, so they are DMA'd once and stay resident in VMEM.
    mh = _bilinear_matrix(Ht, Hp)                               # (Ht, Hp)
    mw_t = np.ascontiguousarray(_bilinear_matrix(Wt, Wp).T)     # (Wp, Wt)
    mh_b = jnp.asarray(np.ascontiguousarray(np.broadcast_to(mh, (TB, Ht, Hp))),
                       dtype=mxu_dtype)
    mwt_b = jnp.asarray(np.ascontiguousarray(np.broadcast_to(mw_t, (TB, Wp, Wt))),
                        dtype=mxu_dtype)

    # Free metadata reshape (merge B,C). TB divides N exactly -> no padding pass.
    pred3 = pred.reshape(N, Hp, Wp)
    tgt3 = target.reshape(N, Ht, Wt)

    kernel = functools.partial(
        _depth_loss_kernel,
        alpha=float(alpha), beta=float(beta),
        inv_l1=1.0 / float(N * Ht * Wt),
        inv_gx=1.0 / float(N * Ht * (Wt - 1)),
        inv_gy=1.0 / float(N * (Ht - 1) * Wt),
        mxu_dtype=mxu_dtype)

    partials = pl.pallas_call(
        kernel,
        out_shape=jax.ShapeDtypeStruct((NB, 8, 128), jnp.float32),
        grid_spec=pltpu.PrefetchScalarGridSpec(
            num_scalar_prefetch=0,
            grid=(NB,),
            in_specs=[
                pl.BlockSpec((TB, Wp, Wt), lambda i: (0, 0, 0)),   # mw^T (resident)
                pl.BlockSpec((TB, Ht, Hp), lambda i: (0, 0, 0)),   # mh   (resident)
                pl.BlockSpec((TB, Hp, Wp), lambda i: (i, 0, 0)),   # TB pred maps
                pl.BlockSpec((TB, Ht, Wt), lambda i: (i, 0, 0)),   # TB target maps
            ],
            out_specs=pl.BlockSpec((1, 8, 128), lambda i: (i, 0, 0)),
        ),
        compiler_params=pltpu.CompilerParams(
            dimension_semantics=("parallel",),
            vmem_limit_bytes=vmem_limit),
    )(mwt_b, mh_b, pred3, tgt3)

    # TODO(synk): for very large depth maps (e.g. 1080x1920 on v7x) add a second grid
    # axis tiling Ht into row bands (with per-band grad-y seam handling) so a single
    # block never exceeds the VMEM budget even at TB=1.
    return jnp.sum(partials[:, 0, 0])


def _reference_depth_loss(pred, target, alpha=0.5, beta=0.5):
    """Pure-JAX reference (same semantics as the PyTorch module's forward)."""
    B, C, Hp, Wp = pred.shape
    _, _, Ht, Wt = target.shape
    mh = jnp.asarray(_bilinear_matrix(Ht, Hp))
    mw = jnp.asarray(_bilinear_matrix(Wt, Wp))
    p = pred.astype(jnp.float32)
    r = jnp.einsum('oh,bchw->bcow', mh, p)
    r = jnp.einsum('ow,bchw->bcho', mw, r)
    t = target.astype(jnp.float32)
    l1 = jnp.mean(jnp.abs(r - t))
    gx = jnp.mean(jnp.abs((r[..., :, 1:] - r[..., :, :-1]) -
                          (t[..., :, 1:] - t[..., :, :-1])))
    gy = jnp.mean(jnp.abs((r[..., 1:, :] - r[..., :-1, :]) -
                          (t[..., 1:, :] - t[..., :-1, :])))
    return alpha * l1 + beta * (gx + gy)


if __name__ == "__main__":
    key = jax.random.PRNGKey(0)
    k1, k2 = jax.random.split(key)
    # Depth-style shapes: pred at half resolution of the target.
    pred = jax.random.uniform(k1, (2, 4, 8, 8), dtype=jnp.float32)
    target = jax.random.uniform(k2, (2, 4, 16, 16), dtype=jnp.float32)

    loss = jax.block_until_ready(depth_loss(pred, target, alpha=0.5, beta=0.5))
    ref = jax.block_until_ready(_reference_depth_loss(pred, target))
    assert np.allclose(np.asarray(loss), np.asarray(ref), rtol=1e-4, atol=1e-5), (loss, ref)

    print("KERNEL_OK")
</pallas_src>

<mosaic_0001>
module attributes {stable_mosaic.version = 11 : i64} {
  func.func @_depth_loss_kernel(%arg0: i32, %arg1: memref<4x8x16xf32, #tpu.memory_space<vmem>>, %arg2: memref<4x16x8xf32, #tpu.memory_space<vmem>>, %arg3: memref<4x8x8xf32, #tpu.memory_space<vmem>>, %arg4: memref<4x16x16xf32, #tpu.memory_space<vmem>>, %arg5: memref<1x8x128xf32, #tpu.memory_space<vmem>>) attributes {dimension_semantics = [#tpu.dimension_semantics<parallel>], iteration_bounds = array<i64: 2>, scalar_prefetch = 0 : i64, scratch_operands = 0 : i64, tpu.core_type = #tpu.core_type<tc>, window_params = [{pipeline_mode = #tpu.pipeline_mode<synchronous>, transform_indices = @transform_0, window_bounds = array<i64: 4, 8, 16>}, {pipeline_mode = #tpu.pipeline_mode<synchronous>, transform_indices = @transform_1, window_bounds = array<i64: 4, 16, 8>}, {transform_indices = @transform_2, window_bounds = array<i64: 4, 8, 8>}, {transform_indices = @transform_3, window_bounds = array<i64: 4, 16, 16>}, {transform_indices = @transform_4, window_bounds = array<i64: 1, 8, 128>}]} {
    %c0 = arith.constant 0 : index
    %c0_0 = arith.constant 0 : index
    %c0_1 = arith.constant 0 : index
    %0 = vector.load %arg3[%c0, %c0_0, %c0_1] : memref<4x8x8xf32, #tpu.memory_space<vmem>>, vector<4x8x8xf32>
    %c0_2 = arith.constant 0 : index
    %c0_3 = arith.constant 0 : index
    %c0_4 = arith.constant 0 : index
    %1 = vector.load %arg4[%c0_2, %c0_3, %c0_4] : memref<4x16x16xf32, #tpu.memory_space<vmem>>, vector<4x16x16xf32>
    %c0_5 = arith.constant 0 : index
    %c0_6 = arith.constant 0 : index
    %c0_7 = arith.constant 0 : index
    %2 = vector.load %arg1[%c0_5, %c0_6, %c0_7] : memref<4x8x16xf32, #tpu.memory_space<vmem>>, vector<4x8x16xf32>
    "tpu.trace_start"() <{level = 10 : i32, message = "bhw,bwo->bho"}> : () -> ()
    %cst = arith.constant dense<0.000000e+00> : vector<4x8x16xf32>
    %3 = tpu.matmul %0, %2, %cst {dimension_numbers = #tpu.dot_dimension_numbers<[2], [1], [1], [2], [0, 0, 0, 1, 1, 2], [0], [0]>} : vector<4x8x8xf32>, vector<4x8x16xf32>, vector<4x8x16xf32> -> vector<4x8x16xf32>
    "tpu.trace_stop"() : () -> ()
    %c0_8 = arith.constant 0 : index
    %c0_9 = arith.constant 0 : index
    %c0_10 = arith.constant 0 : index
    %4 = vector.load %arg2[%c0_8, %c0_9, %c0_10] : memref<4x16x8xf32, #tpu.memory_space<vmem>>, vector<4x16x8xf32>
    "tpu.trace_start"() <{level = 10 : i32, message = "boh,bhw->bow"}> : () -> ()
    %cst_11 = arith.constant dense<0.000000e+00> : vector<4x16x16xf32>
    %5 = tpu.matmul %4, %3, %cst_11 {dimension_numbers = #tpu.dot_dimension_numbers<[2], [1], [1], [2], [0, 0, 0, 1, 1, 2], [0], [0]>} : vector<4x16x8xf32>, vector<4x8x16xf32>, vector<4x16x16xf32> -> vector<4x16x16xf32>
    "tpu.trace_stop"() : () -> ()
    %6 = arith.subf %5, %1 : vector<4x16x16xf32>
    %7 = math.absf %6 : vector<4x16x16xf32>
    %8 = vector.shape_cast %7 : vector<4x16x16xf32> to vector<1x4x16x16xf32>
    %cst_12 = arith.constant dense<0.000000e+00> : vector<1xf32>
    %9 = vector.multi_reduction <add>, %8, %cst_12 [1, 2, 3] : vector<1x4x16x16xf32> to vector<1xf32>
    %10 = vector.shape_cast %9 : vector<1xf32> to vector<1x1x1x1xf32>
    %11 = vector.extract %10[0, 0, 0, 0] : f32 from vector<1x1x1x1xf32>
    %12 = vector.extract_strided_slice %6 {offsets = [0, 0, 1], sizes = [4, 16, 15], strides = [1, 1, 1]} : vector<4x16x16xf32> to vector<4x16x15xf32>
    %13 = vector.extract_strided_slice %6 {offsets = [0, 0, 0], sizes = [4, 16, 15], strides = [1, 1, 1]} : vector<4x16x16xf32> to vector<4x16x15xf32>
    %14 = arith.subf %12, %13 : vector<4x16x15xf32>
    %15 = math.absf %14 : vector<4x16x15xf32>
    %16 = vector.shape_cast %15 : vector<4x16x15xf32> to vector<1x4x16x15xf32>
    %cst_13 = arith.constant dense<0.000000e+00> : vector<1xf32>
    %17 = vector.multi_reduction <add>, %16, %cst_13 [1, 2, 3] : vector<1x4x16x15xf32> to vector<1xf32>
    %18 = vector.shape_cast %17 : vector<1xf32> to vector<1x1x1x1xf32>
    %19 = vector.extract %18[0, 0, 0, 0] : f32 from vector<1x1x1x1xf32>
    %20 = vector.extract_strided_slice %6 {offsets = [0, 1, 0], sizes = [4, 15, 16], strides = [1, 1, 1]} : vector<4x16x16xf32> to vector<4x15x16xf32>
    %21 = vector.extract_strided_slice %6 {offsets = [0, 0, 0], sizes = [4, 15, 16], strides = [1, 1, 1]} : vector<4x16x16xf32> to vector<4x15x16xf32>
    %22 = arith.subf %20, %21 : vector<4x15x16xf32>
    %23 = math.absf %22 : vector<4x15x16xf32>
    %24 = vector.shape_cast %23 : vector<4x15x16xf32> to vector<1x4x15x16xf32>
    %cst_14 = arith.constant dense<0.000000e+00> : vector<1xf32>
    %25 = vector.multi_reduction <add>, %24, %cst_14 [1, 2, 3] : vector<1x4x15x16xf32> to vector<1xf32>
    %26 = vector.shape_cast %25 : vector<1xf32> to vector<1x1x1x1xf32>
    %27 = vector.extract %26[0, 0, 0, 0] : f32 from vector<1x1x1x1xf32>
    %cst_15 = arith.constant 4.8828125E-4 : f32
    %28 = arith.mulf %11, %cst_15 : f32
    %cst_16 = arith.constant 5.000000e-01 : f32
    %29 = arith.mulf %cst_16, %28 : f32
    %cst_17 = arith.constant 5.2083336E-4 : f32
    %30 = arith.mulf %19, %cst_17 : f32
    %cst_18 = arith.constant 5.2083336E-4 : f32
    %31 = arith.mulf %27, %cst_18 : f32
    %32 = arith.addf %30, %31 : f32
    %cst_19 = arith.constant 5.000000e-01 : f32
    %33 = arith.mulf %cst_19, %32 : f32
    %34 = arith.addf %29, %33 : f32
    %35 = vector.broadcast %34 : f32 to vector<1x8x128xf32>
    %c0_20 = arith.constant 0 : index
    %c0_21 = arith.constant 0 : index
    %c0_22 = arith.constant 0 : index
    %36 = vector.load %arg5[%c0_20, %c0_21, %c0_22] : memref<1x8x128xf32, #tpu.memory_space<vmem>>, vector<1x8x128xf32>
    tpu.vector_store %arg5[%c0_20, %c0_21, %c0_22], %35 {strides = array<i32>} : memref<1x8x128xf32, #tpu.memory_space<vmem>>, vector<1x8x128xf32>,
    return
  }
  func.func @transform_0(%arg0: i32) -> (i32, i32, i32) {
    %c0_i32 = arith.constant 0 : i32
    %c0_i32_0 = arith.constant 0 : i32
    %c0_i32_1 = arith.constant 0 : i32
    %c0_i32_2 = arith.constant 0 : i32
    return %c0_i32, %c0_i32_0, %c0_i32_1 : i32, i32, i32
  }
  func.func @transform_1(%arg0: i32) -> (i32, i32, i32) {
    %c0_i32 = arith.constant 0 : i32
    %c0_i32_0 = arith.constant 0 : i32
    %c0_i32_1 = arith.constant 0 : i32
    %c0_i32_2 = arith.constant 0 : i32
    return %c0_i32, %c0_i32_0, %c0_i32_1 : i32, i32, i32
  }
  func.func @transform_2(%arg0: i32) -> (i32, i32, i32) {
    %c0_i32 = arith.constant 0 : i32
    %c0_i32_0 = arith.constant 0 : i32
    %c0_i32_1 = arith.constant 0 : i32
    return %arg0, %c0_i32, %c0_i32_0 : i32, i32, i32
  }
  func.func @transform_3(%arg0: i32) -> (i32, i32, i32) {
    %c0_i32 = arith.constant 0 : i32
    %c0_i32_0 = arith.constant 0 : i32
    %c0_i32_1 = arith.constant 0 : i32
    return %arg0, %c0_i32, %c0_i32_0 : i32, i32, i32
  }
  func.func @transform_4(%arg0: i32) -> (i32, i32, i32) {
    %c0_i32 = arith.constant 0 : i32
    %c0_i32_0 = arith.constant 0 : i32
    %c0_i32_1 = arith.constant 0 : i32
    return %arg0, %c0_i32, %c0_i32_0 : i32, i32, i32
  }
}

</mosaic_0001>

<bundles_post_ra>
// kernel: tpu_custom_call.1
= control target key start
LH: loop header
LB: loop body
LE: loop exit
PB: predicated region body
PF: predicated region fallthrough
CT: control target
= control target key end

     0   :  { %s1825_s0 = inlined_call_operand.vmem [shape: f32[4,8,16], index: 0, kind: input, shape index: {}]   ;;  %s1826_s1 = inlined_call_operand.vmem [shape: f32[4,16,8], index: 1, kind: input, shape index: {}]   ;;  %s1827_s2 = inlined_call_operand.vmem [shape: f32[8,8,8], index: 2, kind: input, shape index: {}]   ;;  %s1828_s3 = inlined_call_operand.hbm [shape: f32[8,16,16], index: 3, kind: input, shape index: {}]   ;;  %s1829_s4 = inlined_call_operand.hbm [shape: f32[2,8,128], index: 4, kind: output, shape index: {}]  }
   0x1   :  { %1831 = sst [smem:[#allocation8_spill]] %s1825_s0 }
   0x2   :  { %9 = vsyncpa [#allocation3], 0 }
   0x3   :  { %11 = vsyncpa [#allocation3 + $0x1], 0 }
   0x4   :  { %12 = vsyncpa [#allocation4], 0 }
   0x5   :  { %14 = vsyncpa [#allocation4 + $0x1], 0  ;;  %s1502_s15 = smov 0   ;;  %s1504_s16 = smov 0  }
   0x6   :  { %s1506_s17 = smov 0   ;;  %s1508_s18 = smov 0  }
   0x7 LB: > { %s1523_s19 = sadd.s32 4294967295, %s1467_s18   ;;  %s1223_s20 = sadd.s32 4294967294, %s1467_s18   ;;  %s1467_s18 = sphi %s1508_s18, %s1844_s18   ;;  %s1463_s17 = sphi %s1506_s17, %s1843_s17   ;;  %s1459_s16 = sphi %s1504_s16, %s1842_s16   ;;  %s1455_s15 = sphi %s1502_s15, %s1841_s15  }
   0x8   : > { %s1527_s21 = sadd.s32 1, %s1467_s18   ;;  %s95_s22 = sadd.s32 1, %s1463_s17 }
   0x9   : > { %s92_s23 = ssub.s32 %s1467_s18, %s1527_s21  ;;  %p102_p0 = scmp.ne.s32.totalorder %s1463_s17, %s1459_s16 }
   0xa   : > { %p93_p1 = scmp.eq.s32.totalorder %s92_s23, 0  ;;  %p103_p2 = scmp.eq.s32.totalorder %s1467_s18, 0 }
   0xb   : > { %p108_p3 = scmp.ne.s32.totalorder %s1459_s16, %s1455_s15  ;;  %p109_p4 = scmp.eq.s32.totalorder %s1523_s19, 0 }
   0xc   : > { %s1539_s24 = scalar_select %p93_p1, %s1463_s17, %s95_s22  }
   0xd   : > { %p1541_p5 = por %p103_p2, %p102_p0  ;;  %p1545_p6 = por %p109_p4, %p108_p3 }
   0xe   : > { %p132_p7 = scmp.eq.s32.totalorder %s1523_s19, 1  ;;  %p138_p8 = scmp.eq.s32.totalorder %s1223_s20, 1 }
   0xf   : > { %p1331_p10 = scmp.lt.s32.totalorder %s1467_s18, 2  ;;  %s173_s29 = sand.u32 1, %s1463_s17  }
  0x10   : > { %p1552_p11 = por %p132_p7, %p102_p0  ;;  %p1556_p12 = por %p138_p8, %p108_p3 }
  0x11   : > { %s1252_s30 = sshll.u32 %s1467_s18, 10  ;;  %s1226_s5 = sshll.u32 %s173_s29, 6 }
  0x12   : > { %s1834_s27 = scalar_select %p1552_p11, 1, 0 }
  0x13   : > { %s1835_s28 = scalar_select %p1556_p12, 1, 0 }
  0x14   : > { %s1565_s8 = scalar_lea.hbm %s1828_s3, %s1252_s30  ;;  %s177_s9 = scalar_lea.vmem [#allocation2], %s1226_s5 }
  0x15   : > { %s185_s10 = sshll.u32 %s177_s9, 4  ;;  %p1569_p13 = pnand %p1331_p10, %p1541_p5  ;;  %s1573_s10 = int_to_ptr.vmem [resolvable:$true] %s185_s10 }
  0x16   : > { %s1575_s12 = scalar_lea.sflag [#allocation3], %s173_s29  ;;  %s1371_s13 = scalar_lea.hbm %s1565_s8, 1024 }
  0x17   : > { %p1372_p0 = scmp.ne.s32.totalorder %s1565_s8, %s1371_s13  ;;  %p1373_p1 = pneg %p1569_p13 }
  0x18   : > { %s1376_s22 = scalar_lea.hbm %s1828_s3, 2048  ;;  %p1377_p4 = scmp.lt.u32.totalorder %s1565_s8, %s1828_s3 }
  0x19   : > { %p1374_p2 = pnand %p1373_p1, %p1372_p0  ;;  %p1378_p5 = scmp.lt.u32.totalorder %s1376_s22, %s1371_s13 }
  0x1a   : > { %p1380_p8 = scmp.lt.u32.totalorder %s1371_s13, %s1565_s8 }
  0x1b   : > { %p1375_p3 = pneg %p1374_p2  ;;  %p1379_p7 = por %p1378_p5, %p1377_p4 }
  0x1d   : > { %p1381_p10 = por %p1380_p8, %p1379_p7 }
  0x1f   : > { %p1382_p9 = pnand %p1381_p10, %p1375_p3 }
  0x21   : > { %1385 = shalt.err (!%p1382_p9)
}
  0x22   : > { %s1386_s29 = scalar_lea.vmem %s1573_s10, 1024  ;;  %s1469_s30 = smov [#allocation2]  }
  0x23   : > { %p1387_p0 = scmp.ne.s32.totalorder %s1573_s10, %s1386_s29  ;;  %s1391_s5 = sshll.u32 %s1469_s30, 4  ;;  %s1392_s5 = int_to_ptr.vmem [resolvable:$false] %s1391_s5 }
  0x24   : > { %s1393_s6 = scalar_lea.vmem %s1392_s5, 2048  ;;  %p1394_p11 = scmp.lt.s32.totalorder %s1573_s10, %s1392_s5 }
  0x25   : > { %p1389_p2 = pnand %p1387_p0, %p1373_p1  ;;  %p1395_p4 = scmp.lt.s32.totalorder %s1393_s6, %s1386_s29 }
  0x27   : > { %p1390_p12 = pneg %p1389_p2  ;;  %p1396_p5 = por %p1395_p4, %p1394_p11 }
  0x29   : > { %p1397_p7 = pnand %p1396_p5, %p1390_p12 }
  0x2b   : > { %1400 = shalt.err (!%p1397_p7)
}
  0x2c   : > { %s1470_s7 = smov 128   ;;  %s1471_s9 = smov 8  }
  0x2d   : > { %1326 = dma.hbm_to_vmem [thread:$0]  (!%p1569_p13), %s1565_s8, 1024, %s1573_s10, %s1575_s12, %s1470_s7, %s1470_s7, %s1471_s9  }
  0x2e   : > { %p1230_p9 = scmp.ge.s32.totalorder %s1467_s18, 1  ;;  %p193_p1 = scmp.lt.s32.totalorder %s1467_s18, 3 }
  0x30   : > { %p194_p3 = pnand %p1230_p9, %p193_p1 }
  0x31   : > { %s1606_s13 = sand.u32 (!%p194_p3), 1, %s1459_s16  }
  0x32   : > { %197 = sbr.rel (%p194_p3) target bundleno = 976 (0x3d0), region = 36  ;;  %s1231_s14 = sshll.u32 (!%p194_p3), %s1606_s13, 6 }
  0x33   : > { %s200_s20 = scalar_lea.sflag (!%p194_p3), [#allocation3], %s1606_s13  ;;  %s1610_s22 = scalar_lea.vmem (!%p194_p3), [#allocation2], %s1231_s14 }
  0x39   : > { %1446 = dma.done.wait (%p1545_p6), %s200_s20, 1024  }
  0x3a   : > { %1448 = vsyncadd (%p1545_p6), %s200_s20, 4294966272  ;;  %s1233_s8 = sshll.u32 %s1523_s19, 2  ;;  %v1472_v0 = vmov 0.0   ;;  %vm1473_vm0 = vmmov 0   ;;  %vm256_vm1 = vcmask 64512   ;;  %s1837_s0 = sld [smem:[#allocation8_spill]] }
  0x3b   : > { %1273 = vmatprep.subr.mxu0 %v1472_v0  ;;  %1278 = vmatprep.subr.mxu1 %v1472_v0  ;;  %p234_p11 = scmp.lt.s32.totalorder %s1233_s8, 7  ;;  %v549_v9 = vld [vmem:[%s1826_s1] sm:$0xff]  ;;  %v551_v10 = vld [vmem:[%s1826_s1 + $0x10] sm:$0xff]  ;;  %v550_v13 = vld [vmem:[%s1826_s1 + $0x8] sm:$0xff]  ;;  %s1474_s20 = smov 1   ;;  %vm1027_vm2 = vcmask 1040384  }
  0x3c   : > { %1275 = vmatprep.mubr.msk.f32.mxu0 %vm1473_vm0, %v1472_v0  ;;  %1280 = vmatprep.mubr.msk.f32.mxu1 %vm1473_vm0, %v1472_v0  ;;  %v552_v14 = vld [vmem:[%s1826_s1 + $0x18] sm:$0xff]  ;;  %v553_v17 = vld [vmem:[%s1826_s1 + $0x20] sm:$0xff]  ;;  %v555_v18 = vld [vmem:[%s1826_s1 + $0x30] sm:$0xff]  ;;  %vm897_vm3 = vcmask 130048   ;;  %vm1072_vm4 = vcmask 1046528   ;;  %vm1094_vm5 = vcmask 129024  }
  0x3d   : > { %s1846_s8 = smov (!%p234_p11, %s1233_s8), 7  ;;  %v554_v20 = vld [vmem:[%s1826_s1 + $0x28] sm:$0xff]  ;;  %v556_v22 = vld [vmem:[%s1826_s1 + $0x38] sm:$0xff]  ;;  %v244_v25 = vld [vmem:[%s1610_s22] sm:$0xff]  ;;  %vm1002_vm6 = vcmask 121856   ;;  %s1248_s5 = sshll.u32 %s1523_s19, 7 }
  0x3e   : > { %s1234_s10 = sshll.u32 %s1846_s8, 3  ;;  %v246_v26 = vld [vmem:[%s1610_s22 + $0x10] sm:$0xff]  ;;  %v245_v33 = vld [vmem:[%s1610_s22 + $0x8] sm:$0xff]  ;;  %v247_v34 = vld [vmem:[%s1610_s22 + $0x18] sm:$0xff]  ;;  %p1838_p12 = scmp.ne.s32.totalorder %s1834_s27, 0 }
  0x3f   : > { %s237_s23 = scalar_lea.vmem %s1827_s2, %s1234_s10  ;;  %v249_v41 = vld [vmem:[%s1610_s22 + $0x28] sm:$0xff]  ;;  %v248_v42 = vld [vmem:[%s1610_s22 + $0x20] sm:$0xff]  ;;  %v251_v45 = vld [vmem:[%s1610_s22 + $0x38] sm:$0xff]  ;;  %s1232_s10 = sshll.u32 %s1606_s13, 3 }
  0x40   : > { %v252_v1 = vld [vmem:[%s1837_s0] sm:$0xff]  ;;  %v253_v2 = vld [vmem:[%s1837_s0 + $0x8] sm:$0xff]  ;;  %v254_v5 = vld [vmem:[%s1837_s0 + $0x10] sm:$0xff]  ;;  %s232_s7 = scalar_lea.vmem [#allocation5], %s1232_s10  ;;  %s1476_s19 = smov [#allocation5]  }
  0x41   : > { %v240_v3 = vld [vmem:[%s237_s23] sm:$0xff]  ;;  %1274 = vmatpush3.msra.mxu0 %v252_v1  ;;  %1279 = vmatpush3.msra.mxu1 %v253_v2  ;;  %v241_v4 = vld [vmem:[%s237_s23 + $0x8] sm:$0xff]  ;;  %v255_v6 = vld [vmem:[%s1837_s0 + $0x18] sm:$0xff]  ;;  %s1141_s9 = sshll.u32 %s232_s7, 4  ;;  %s1781_s0 = scalar_lea.hbm %s1829_s4, %s1248_s5  ;;  %s1783_s9 = int_to_ptr.vmem [resolvable:$true] %s1141_s9 }
  0x42   : > { %1276 = vmatmul.mubr.msk.f32.vlgmr.msra.gmra.mrb[0].mxu0 %vm256_vm1, %v240_v3  ;;  %1281 = vmatmul.mubr.msk.f32.vlgmr.msra.gmra.mrb[0].mxu1 %vm256_vm1, %v241_v4  ;;  %v242_v7 = vld [vmem:[%s237_s23 + $0x10] sm:$0xff]  ;;  %v243_v8 = vld [vmem:[%s237_s23 + $0x18] sm:$0xff]  ;;  %s1405_s10 = sshll.u32 %s1476_s19, 4  ;;  %s1406_s10 = int_to_ptr.vmem [resolvable:$false] %s1405_s10 }
  0x43   : > { %1283 = vmatprep.subr.mxu0 %v1472_v0  ;;  %1285 = vmatprep.mubr.msk.f32.mxu0 %vm1473_vm0, %v1472_v0  ;;  %v250_v46 = vld [vmem:[%s1610_s22 + $0x30] sm:$0xff]  ;;  %s1475_s22 = smov 127   ;;  %p1408_p10 = scmp.lt.s32.totalorder %s1783_s9, %s1406_s10 }
  0x44   : > { %1284 = vmatpush3.msra.mxu0 %v254_v5  ;;  %1288 = vmatprep.subr.mxu1 %v1472_v0 }
  0x45   : > { %1289 = vmatpush3.msra.mxu1 %v255_v6  ;;  %1290 = vmatprep.mubr.msk.f32.mxu1 %vm1473_vm0, %v1472_v0 }
  0x46   : > { %1286 = vmatmul.mubr.msk.f32.vlgmr.msra.gmra.mrb[2].mxu0 %vm256_vm1, %v242_v7  ;;  %1291 = vmatmul.mubr.msk.f32.vlgmr.msra.gmra.mrb[2].mxu1 %vm256_vm1, %v243_v8 }
  0x47   : > { %1295 = vmatprep.mubr.msk.f32.mxu0 %vm256_vm1, %v549_v9  ;;  %1300 = vmatprep.mubr.msk.f32.mxu1 %vm256_vm1, %v551_v10 }
 0x115   : > { %v326_v11 = vpop.f32.mrb[0].mxu0  ;;  %v399_v12 = vpop.f32.mrb[0].mxu1 }
 0x116   : > { %v1277_v15 = vpop.f32.mrb[1].mxu0  ;;  %1293 = vmatprep.subr.mxu0 %v326_v11  ;;  %1298 = vmatprep.subr.mxu1 %v399_v12  ;;  %v1282_v16 = vpop.f32.mrb[1].mxu1 }
 0x117   : > { %1294 = vmatpush3.msra.mxu0 %v326_v11  ;;  %1299 = vmatpush3.msra.mxu1 %v399_v12 }
 0x118   : > { %1296 = vmatmul.mubr.msk.f32.vlgmr.msra.gmra.mrb[4].mxu0 %vm256_vm1, %v550_v13  ;;  %1301 = vmatmul.mubr.msk.f32.vlgmr.msra.gmra.mrb[4].mxu1 %vm256_vm1, %v552_v14 }
 0x119   : > { %v472_v19 = vpop.f32.mrb[2].mxu0  ;;  %1305 = vmatprep.mubr.msk.f32.mxu0 %vm256_vm1, %v553_v17  ;;  %v545_v21 = vpop.f32.mrb[2].mxu1  ;;  %1310 = vmatprep.mubr.msk.f32.mxu1 %vm256_vm1, %v555_v18 }
 0x11a   : > { %1303 = vmatprep.subr.mxu0 %v472_v19  ;;  %v1287_v23 = vpop.f32.mrb[3].mxu0  ;;  %1308 = vmatprep.subr.mxu1 %v545_v21  ;;  %v1292_v24 = vpop.f32.mrb[3].mxu1 }
 0x11b   : > { %1304 = vmatpush3.msra.mxu0 %v472_v19  ;;  %1309 = vmatpush3.msra.mxu1 %v545_v21 }
 0x11c   : > { %1306 = vmatmul.mubr.msk.f32.vlgmr.msra.gmra.mrb[6].mxu0 %vm256_vm1, %v554_v20  ;;  %1311 = vmatmul.mubr.msk.f32.vlgmr.msra.gmra.mrb[6].mxu1 %vm256_vm1, %v556_v22 }
 0x1eb   : > { %v1297_v27 = vpop.f32.mrb[4].mxu0  ;;  %v1302_v28 = vpop.f32.mrb[4].mxu1 }
 0x1ec   : > { %v629_v29 = vpop.f32.mrb[5].mxu0  ;;  %v710_v30 = vpop.f32.mrb[5].mxu1  ;;  %v1682_v37 = vsub.f32 %v1297_v27, %v245_v33  ;;  %v1684_v38 = vsub.f32 %v1302_v28, %v247_v34 }
 0x1ed   : > { %v1674_v31 = vsub.f32 %v629_v29, %v244_v25  ;;  %v1676_v32 = vsub.f32 %v710_v30, %v246_v26 }
 0x1ee   : > { %v1029_v51 = vrot.slane %v1682_v37, 7  ;;  %v1032_v60 = vrot.slane %v1684_v38, 7  ;;  %v890_v17 = vand.u32 2147483647, %v1682_v37 }
 0x1ef   : > { %934 = vrot.lane.b32.xlu1 %v1676_v32, %s1474_s20  ;;  %930 = vrot.lane.b32.xlu0 %v1674_v31, %s1474_s20  ;;  %v1307_v35 = vpop.f32.mrb[6].mxu0  ;;  %v1312_v36 = vpop.f32.mrb[6].mxu1  ;;  %v1028_v52 = vrot.slane %v1674_v31, 7  ;;  %v1031_v61 = vrot.slane %v1676_v32, 7  ;;  %v889_v20 = vand.u32 2147483647, %v1674_v31 }
 0x1f0   : > { %v791_v39 = vpop.f32.mrb[7].mxu0  ;;  %v872_v40 = vpop.f32.mrb[7].mxu1  ;;  %v1690_v43 = vsub.f32 %v1307_v35, %v249_v41  ;;  %v1698_v47 = vsub.f32 %v1312_v36, %v251_v45  ;;  %v891_v29 = vand.u32 2147483647, %v1676_v32  ;;  %v899_v33 = vsel %vm897_vm3, %v890_v17, 0.0 }
 0x1f1   : > { %v1692_v44 = vsub.f32 %v791_v39, %v248_v42  ;;  %v1700_v48 = vsub.f32 %v872_v40, %v250_v46  ;;  %v1030_v59 = vsel %vm1027_vm2, %v1028_v52, %v1029_v51  ;;  %v1048_v1 = vsub.f32 %v1674_v31, %v1028_v52 }
 0x1f2   : > { %v1049_v4 = vsub.f32 %v1682_v37, %v1030_v59  ;;  %v1033_v9 = vsel %vm1027_vm2, %v1031_v61, %v1032_v60  ;;  %v1035_v14 = vrot.slane %v1690_v43, 7  ;;  %v1050_v18 = vsub.f32 %v1676_v32, %v1031_v61 }
 0x1f3   : > { %936 = vrot.lane.b32.xlu1 %v1684_v38, %s1474_s20  ;;  %932 = vrot.lane.b32.xlu0 %v1682_v37, %s1474_s20  ;;  %v1056_v10 = vand.u32 2147483647, %v1048_v1  ;;  %v1034_v15 = vrot.slane %v1692_v44, 7  ;;  %v1051_v19 = vsub.f32 %v1684_v38, %v1033_v9  ;;  %v1038_v39 = vrot.slane %v1698_v47, 7 }
 0x1f4   : > { %v1057_v13 = vand.u32 2147483647, %v1049_v4  ;;  %v1058_v27 = vand.u32 2147483647, %v1050_v18  ;;  %v892_v42 = vand.u32 2147483647, %v1684_v38 }
 0x1f5   : > { %v1073_v24 = vrot.slane %v1056_v10, 1  ;;  %v1036_v26 = vsel %vm1027_vm2, %v1034_v15, %v1035_v14  ;;  %v1059_v28 = vand.u32 2147483647, %v1051_v19  ;;  %v1052_v34 = vsub.f32 %v1692_v44, %v1034_v15 }
 0x1f6   : > { %v1074_v25 = vrot.slane %v1057_v13, 1  ;;  %v1053_v35 = vsub.f32 %v1690_v43, %v1036_v26  ;;  %v1076_v40 = vrot.slane %v1058_v27, 1  ;;  %v901_v45 = vsel %vm897_vm3, %v891_v29, 0.0 }
 0x1f7   : > { %940 = vrot.lane.b32.xlu1 %v1690_v43, %s1474_s20  ;;  %938 = vrot.lane.b32.xlu0 %v1692_v44, %s1474_s20  ;;  %v1077_v41 = vrot.slane %v1059_v28, 1  ;;  %v896_v13 = vand.u32 2147483647, %v1698_v47 }
 0x1f8   : > { %v1075_v36 = vsel %vm1072_vm4, %v1073_v24, %v1074_v25  ;;  %v1061_v51 = vand.u32 2147483647, %v1053_v35 }
 0x1f9   : > { %v1093_v46 = vsel %vm897_vm3, %v1075_v36, 0.0  ;;  %v1099_v4 = vsel %vm1094_vm5, %v1077_v41, 0.0 }
 0x1fa   : > { %v1080_v60 = vrot.slane %v1061_v51, 1 }
 0x1fb   : > { %944 = vrot.lane.b32.xlu1 %v1698_v47, %s1474_s20  ;;  %942 = vrot.lane.b32.xlu0 %v1700_v48, %s1474_s20 }
 0x261   : > { %v935_v49 = vpop.permute.xlu1 %934  ;;  %v931_v50 = vpop.permute.xlu0 %930 }
 0x262   : > { %v954_v53 = vsub.f32 %v1674_v31, %v931_v50  ;;  %v956_v54 = vsub.f32 %v1676_v32, %v935_v49  ;;  %v898_v31 = vsel %vm897_vm3, %v889_v20, 0.0  ;;  %v1095_v49 = vsel %vm1094_vm5, %v1074_v25, 0.0 }
 0x263   : > { %v900_v32 = vadd.f32 %v899_v33, %v898_v31  ;;  %v1060_v50 = vand.u32 2147483647, %v1052_v34 }
 0x264   : > { %v962_v55 = vand.u32 2147483647, %v954_v53  ;;  %v964_v62 = vand.u32 2147483647, %v956_v54  ;;  %v1078_v54 = vsel %vm1072_vm4, %v1076_v40, %v1077_v41 }
 0x265   : > { %v937_v56 = vpop.permute.xlu1 %936  ;;  %v933_v57 = vpop.permute.xlu0 %932  ;;  %v902_v53 = vadd.f32 %v901_v45, %v900_v32  ;;  %v1079_v59 = vrot.slane %v1060_v50, 1  ;;  %v1097_v61 = vsel %vm897_vm3, %v1078_v54, 0.0 }
 0x266   : > { %v955_v58 = vsub.f32 %v1682_v37, %v933_v57  ;;  %978 = vrot.lane.b32.xlu0 %v962_v55, %s1475_s22  ;;  %v957_v63 = vsub.f32 %v1684_v38, %v937_v56  ;;  %v1037_v37 = vrot.slane %v1700_v48, 7  ;;  %v1096_v55 = vadd.f32 %v1095_v49, %v1093_v46 }
 0x267   : > { %v893_v56 = vand.u32 2147483647, %v1692_v44  ;;  %v903_v57 = vsel %vm897_vm3, %v892_v42, 0.0 }
 0x268   : > { %v963_v0 = vand.u32 2147483647, %v955_v58  ;;  %v965_v6 = vand.u32 2147483647, %v957_v63  ;;  %v1039_v52 = vsel %vm1027_vm2, %v1037_v37, %v1038_v39  ;;  %v1054_v38 = vsub.f32 %v1700_v48, %v1037_v37 }
 0x269   : > { %v941_v2 = vpop.permute.xlu1 %940  ;;  %v939_v3 = vpop.permute.xlu0 %938  ;;  %v1055_v58 = vsub.f32 %v1698_v47, %v1039_v52  ;;  %v1098_v63 = vadd.f32 %v1097_v61, %v1096_v55  ;;  %v905_v1 = vsel %vm897_vm3, %v893_v56, 0.0 }
 0x26a   : > { %v958_v5 = vsub.f32 %v1692_v44, %v939_v3  ;;  %980 = vrot.lane.b32.xlu1 %v963_v0, %s1475_s22  ;;  %982 = vrot.lane.b32.xlu0 %v964_v62, %s1475_s22  ;;  %v959_v7 = vsub.f32 %v1690_v43, %v941_v2  ;;  %v904_v62 = vadd.f32 %v903_v57, %v902_v53  ;;  %v894_v0 = vand.u32 2147483647, %v1690_v43 }
 0x26b   : > { %v1062_v2 = vand.u32 2147483647, %v1054_v38  ;;  %v1063_v3 = vand.u32 2147483647, %v1055_v58  ;;  %v1081_v44 = vsel %vm1072_vm4, %v1079_v59, %v1080_v60 }
 0x26c   : > { %v966_v8 = vand.u32 2147483647, %v958_v5  ;;  %v967_v21 = vand.u32 2147483647, %v959_v7  ;;  %v906_v5 = vadd.f32 %v905_v1, %v904_v62  ;;  %v895_v7 = vand.u32 2147483647, %v1700_v48 }
 0x26d   : > { %v945_v11 = vpop.permute.xlu1 %944  ;;  %v943_v12 = vpop.permute.xlu0 %942  ;;  %v1101_v9 = vsel %vm897_vm3, %v1081_v44, 0.0  ;;  %v1082_v10 = vrot.slane %v1062_v2, 1 }
 0x26e   : > { %v960_v16 = vsub.f32 %v1700_v48, %v943_v12  ;;  %984 = vrot.lane.b32.xlu1 %v965_v6, %s1475_s22  ;;  %986 = vrot.lane.b32.xlu0 %v966_v8, %s1475_s22  ;;  %v961_v22 = vsub.f32 %v1698_v47, %v945_v11  ;;  %v1100_v6 = vadd.f32 %v1099_v4, %v1098_v63  ;;  %v907_v8 = vsel %vm897_vm3, %v894_v0, 0.0 }
 0x26f   : > { %v1083_v11 = vrot.slane %v1063_v3, 1  ;;  %v908_v12 = vadd.f32 %v907_v8, %v906_v5  ;;  %v909_v14 = vsel %vm897_vm3, %v895_v7, 0.0  ;;  %v911_v48 = vsel %vm897_vm3, %v896_v13, 0.0 }
 0x270   : > { %v968_v23 = vand.u32 2147483647, %v960_v16  ;;  %v969_v30 = vand.u32 2147483647, %v961_v22  ;;  %v1102_v43 = vadd.f32 %v1101_v9, %v1100_v6  ;;  %v1103_v16 = vsel %vm1094_vm5, %v1080_v60, 0.0 }
 0x271   : > { %v1084_v15 = vsel %vm1072_vm4, %v1082_v10, %v1083_v11  ;;  %v910_v17 = vadd.f32 %v909_v14, %v908_v12  ;;  %v1107_v22 = vsel %vm1094_vm5, %v1083_v11, 0.0 }
 0x272   : > { %988 = vrot.lane.b32.xlu1 %v967_v21, %s1475_s22  ;;  %990 = vrot.lane.b32.xlu0 %v968_v23, %s1475_s22  ;;  %v1104_v18 = vadd.f32 %v1103_v16, %v1102_v43  ;;  %v1105_v19 = vsel %vm897_vm3, %v1084_v15, 0.0 }
 0x273   : > { %v912_v20 = vadd.f32 %v911_v48, %v910_v17 }
 0x274   : > { %v1106_v21 = vadd.f32 %v1105_v19, %v1104_v18 }
 0x276   : > { %992 = vrot.lane.b32.xlu1 %v969_v30, %s1475_s22  ;;  %v1108_v23 = vadd.f32 %v1107_v22, %v1106_v21 }
 0x291   : > { %913 = vadd.xlane.f32.xlu0 %v912_v20 }
 0x295   : > { %1109 = vadd.xlane.f32.xlu0 %v1108_v23 }
 0x2d8   : > { %v979_v47 = vpop.permute.xlu0 %978 }
 0x2d9   : > { %v1003_v26 = vsel %vm1002_vm6, %v979_v47, 0.0 }
 0x2dc   : > { %v981_v24 = vpop.permute.xlu1 %980  ;;  %v983_v25 = vpop.permute.xlu0 %982 }
 0x2dd   : > { %v1004_v27 = vsel %vm1002_vm6, %v981_v24, 0.0  ;;  %v1006_v29 = vsel %vm1002_vm6, %v983_v25, 0.0 }
 0x2de   : > { %v1005_v28 = vadd.f32 %v1004_v27, %v1003_v26 }
 0x2e0   : > { %v1007_v30 = vadd.f32 %v1006_v29, %v1005_v28  ;;  %v985_v31 = vpop.permute.xlu1 %984  ;;  %v987_v33 = vpop.permute.xlu0 %986 }
 0x2e1   : > { %v1008_v34 = vsel %vm1002_vm6, %v985_v31, 0.0  ;;  %v1010_v36 = vsel %vm1002_vm6, %v987_v33, 0.0 }
 0x2e2   : > { %v1009_v35 = vadd.f32 %v1008_v34, %v1007_v30 }
 0x2e4   : > { %v1011_v37 = vadd.f32 %v1010_v36, %v1009_v35  ;;  %v989_v39 = vpop.permute.xlu1 %988  ;;  %v991_v40 = vpop.permute.xlu0 %990 }
 0x2e5   : > { %v1012_v32 = vsel %vm1002_vm6, %v989_v39, 0.0  ;;  %v1014_v42 = vsel %vm1002_vm6, %v991_v40, 0.0 }
 0x2e6   : > { %v1013_v41 = vadd.f32 %v1012_v32, %v1011_v37 }
 0x2e8   : > { %v1015_v45 = vadd.f32 %v1014_v42, %v1013_v41  ;;  %v993_v46 = vpop.permute.xlu1 %992 }
 0x2e9   : > { %v1016_v49 = vsel %vm1002_vm6, %v993_v46, 0.0 }
 0x2ea   : > { %v1017_v50 = vadd.f32 %v1016_v49, %v1015_v45 }
 0x2ec   : > { %1018 = vadd.xlane.f32.xlu1 %v1017_v50 }
 0x31e   : > { %v914_v51 = vpop.xlane.xlu0 %913 }
 0x31f   : > { %v915_v52 = vrot.slane %v914_v51, 4 }
 0x321   : > { %v916_v53 = vadd.f32 %v915_v52, %v914_v51 }
 0x322   : > { %v1110_v38 = vpop.xlane.xlu0 %1109 }
 0x323   : > { %v917_v54 = vrot.slane %v916_v53, 2  ;;  %v1111_v58 = vrot.slane %v1110_v38, 4 }
 0x325   : > { %v918_v55 = vadd.f32 %v917_v54, %v916_v53  ;;  %v1112_v59 = vadd.f32 %v1111_v58, %v1110_v38 }
 0x327   : > { %v919_v56 = vrot.slane %v918_v55, 1  ;;  %v1113_v60 = vrot.slane %v1112_v59, 2 }
 0x329   : > { %v920_v57 = vadd.f32 %v919_v56, %v918_v55  ;;  %v1114_v0 = vadd.f32 %v1113_v60, %v1112_v59 }
 0x32b   : > { %1313 = vpush %v920_v57  ;;  %v1115_v3 = vrot.slane %v1114_v0, 1 }
 0x32d   : > { %v1116_v5 = vadd.f32 %v1115_v3, %v1114_v0 }
 0x35c   : > { %s1314_s8 = spop %1313 }
 0x35d   : > { %s1118_s11 = smul.f32 0.00048828125, %s1314_s8  ;;  %s1128_s8 = scalar_lea.sflag [#allocation4], %s1606_s13 }
 0x35f   : > { %s1119_s30 = smul.f32 0.5, %s1118_s11  ;;  %s1407_s11 = scalar_lea.vmem %s1406_s10, 256 }
 0x379   : > { %v1019_v61 = vpop.xlane.xlu1 %1018 }
 0x37a   : > { %v1020_v62 = vrot.slane %v1019_v61, 4 }
 0x37c   : > { %v1021_v63 = vadd.f32 %v1020_v62, %v1019_v61 }
 0x37e   : > { %v1022_v1 = vrot.slane %v1021_v63, 2 }
 0x380   : > { %v1023_v2 = vadd.f32 %v1022_v1, %v1021_v63 }
 0x382   : > { %v1024_v44 = vrot.slane %v1023_v2, 1 }
 0x384   : > { %v1025_v4 = vadd.f32 %v1024_v44, %v1023_v2 }
 0x386   : > { %1315 = vpush %v1025_v4 }
 0x387   : > { %1317 = vpush %v1116_v5 }
 0x3b7   : > { %s1316_s12 = spop %1315 }
 0x3b8   : > { %s1120_s23 = smul.f32 0.00052083336, %s1316_s12  ;;  %s1318_s26 = spop %1317 }
 0x3b9   : > { %s1121_s25 = smul.f32 0.00052083336, %s1318_s26  ;;  %s1401_s12 = scalar_lea.vmem %s1783_s9, 128 }
 0x3ba   : > { %p1402_p6 = scmp.ne.s32.totalorder %s1783_s9, %s1401_s12  ;;  %p1409_p0 = scmp.lt.s32.totalorder %s1407_s11, %s1401_s12 }
 0x3bb   : > { %s1122_s29 = sadd.f32 %s1121_s25, %s1120_s23 }
 0x3bc   : > { %p1403_p13 = pnand %p1402_p6, %p1838_p12  ;;  %p1410_p2 = por %p1409_p0, %p1408_p10 }
 0x3bd   : > { %s1123_s6 = smul.f32 0.5, %s1122_s29 }
 0x3be   : > { %p1404_p8 = pneg %p1403_p13 }
 0x3bf   : > { %s1124_s14 = sadd.f32 %s1123_s6, %s1119_s30 }
 0x3c0   : > { %p1411_p4 = pnand %p1410_p2, %p1404_p8 }
 0x3c1   : > { %v1125_v6 = vstv %s1124_s14 }
 0x3c2   : > { %1126 = vst [vmem:[%s232_s7] sm:$0xff] %v1125_v6 }
 0x3c3   : > { %1414 = shalt.err (!%p1411_p4)
}
 0x3c4   : > { %s1415_s13 = scalar_lea.hbm %s1781_s0, 128  ;;  %s1419_s25 = scalar_lea.hbm %s1829_s4, 256 }
 0x3c5   : > { %p1416_p5 = scmp.ne.s32.totalorder %s1781_s0, %s1415_s13  ;;  %p1420_p1 = scmp.lt.u32.totalorder %s1781_s0, %s1829_s4 }
 0x3c6   : > { %p1421_p3 = scmp.lt.u32.totalorder %s1419_s25, %s1415_s13  ;;  %p1423_p6 = scmp.lt.u32.totalorder %s1415_s13, %s1781_s0 }
 0x3c7   : > { %p1417_p7 = pnand %p1416_p5, %p1838_p12 }
 0x3c8   : > { %p1422_p11 = por %p1421_p3, %p1420_p1 }
 0x3c9   : > { %p1418_p9 = pneg %p1417_p7 }
 0x3ca   : > { %p1424_p13 = por %p1423_p6, %p1422_p11 }
 0x3cc   : > { %p1425_p8 = pnand %p1424_p13, %p1418_p9 }
 0x3ce   : > { %1428 = shalt.err (!%p1425_p8)
}
 0x3cf   : > { %1321 = dma.vmem_to_hbm [thread:$0]  (%p1838_p12), %s1783_s9, 128, %s1781_s0, %s1128_s8  }
 0x3d0 PF: > { %s1153_s5 = sand.u32 1, %s1455_s15   ;;  %p1839_p10 = scmp.ne.s32.totalorder %s1835_s28, 0 }
 0x3d1   : > { %p1840_p0 = scmp.ge.s32.totalorder %s1467_s18, 2  ;;  %s1154_s6 = scalar_lea.sflag [#allocation4], %s1153_s5 }
 0x3d3   : > { %p1328_p2 = pnand %p1840_p0, %p1839_p10 }
 0x3d5   : > { %1450 = dma.done.wait (!%p1328_p2), %s1154_s6, 128  }
 0x3d6   : > { %1452 = vsyncadd (!%p1328_p2), %s1154_s6, 4294967168  ;;  %p17_p4 = scmp.ge.s32.totalorder %s1527_s21, 4   ;;  %s1841_s15 = smov %s1459_s16 }
 0x3d7   : > { %s1842_s16 = smov %s1463_s17  ;;  %s1843_s17 = smov %s1539_s24 }
 0x3d8   : > { %s1844_s18 = smov %s1527_s21  ;;  %19 = sbr.rel (!%p17_p4) target bundleno = 7 (0x7), region = 84 }
 0x3df   :  { %1159 = vsyncpa [#allocation3], 1 }
 0x3e0   :  { %1161 = vsyncpa [#allocation3 + $0x1], 1 }
 0x3e1   :  { %1162 = vsyncpa [#allocation4], 1 }
 0x3e2   :  { %1164 = vsyncpa [#allocation4 + $0x1], 1 }

</bundles_post_ra>
